<compile_context>
chip_gen: v7x
topology: tpu7x:2x2x1
jax: 0.10.0
libtpu: 0.0.40
codegen_flags: <defaults>
</compile_context>

<pallas_src>
import functools
import math

import jax
import jax.numpy as jnp
from jax import lax
from jax.experimental import pallas as pl
from jax.experimental.pallas import tpu as pltpu


# ---------------------------------------------------------------------------
# Pallas kernel: per (order, L-tile) block, generate the sinusoidal positional
# encoding on the fly (EUP sin/cos), project it through the filter weights on
# the MXU (bf16 in, f32 accumulate), add the bias and apply the exponential
# window modulation, writing straight into the (order, E, L) output layout.
# ---------------------------------------------------------------------------
def _hyena_filter_kernel(w_sin_ref, w_cos_ref, b_ref, d_ref, invf_ref, out_ref,
                         *, tile_l, inv_len, shift, causal, causal_limit):
    # w_sin_ref : (E, E//2)  bf16  filter_proj weight, even (sin) cols, this order
    # w_cos_ref : (E, E//2)  bf16  filter_proj weight, odd  (cos) cols, this order
    # b_ref     : (E, 1)     f32   filter_proj bias for this order (column)
    # d_ref     : (E, 1)     f32   |deltas| of the exponential window
    # invf_ref  : (E//2, 1)  f32   positional-encoding inverse frequencies
    # out_ref   : (1, E, tL)       block of the (order, E, L) output
    i = pl.program_id(1)

    # Absolute positions of this L tile: pos[l] = i*tL + l  (f32, lane axis).
    col = lax.broadcasted_iota(jnp.int32, (1, tile_l), 1).astype(jnp.float32)
    pos = col + (i * tile_l).astype(jnp.float32)                    # (1, tL)

    # Positional encoding generated in-kernel (no HBM pe tensor): EUP sin/cos.
    ang = invf_ref[...] * pos                                       # (E//2, tL)
    pe_sin = jnp.sin(ang).astype(w_sin_ref.dtype)
    pe_cos = jnp.cos(ang).astype(w_cos_ref.dtype)

    # MXU: W_sin @ sin + W_cos @ cos == (W @ pe^T) rows of this order, f32 acc.
    h = jnp.dot(w_sin_ref[...], pe_sin, preferred_element_type=jnp.float32)
    h = h + jnp.dot(w_cos_ref[...], pe_cos, preferred_element_type=jnp.float32)

    # Exponential window modulation: exp(-|delta| * pos/(L-1)) (+ shift).
    mod = jnp.exp(-d_ref[...] * (pos * inv_len))                    # (E, tL)
    if shift != 0.0:
        mod = mod + shift
    if causal:
        # HyenaOperator.causal: filters[:, :, L//2 + 1:] = 0.
        mod = jnp.where(pos <= causal_limit, mod, 0.0)

    out_ref[0, :, :] = ((h + b_ref[...]) * mod).astype(out_ref.dtype)


def _tile_defaults():
    """Pick L-tile width and scoped-VMEM limit from the chip's VMEM capacity."""
    try:
        cap = int(pltpu.get_tpu_info().vmem_capacity_bytes)
    except Exception:
        cap = 64 * 1024 * 1024                       # conservative (v7x-sized)
    max_tile_l = 1024 if cap >= 96 * 1024 * 1024 else 512
    vmem_limit = min((cap * 3) // 4, 100 * 1024 * 1024)
    return max_tile_l, vmem_limit


def hyena_filter_pallas(w_sin, w_cos, bias_col, abs_deltas_col, inv_freq_col, *,
                        order, emb, seq_len, shift=0.0, causal=False,
                        out_dtype=jnp.float32):
    E, L = emb, seq_len
    assert E % 2 == 0 and E % 8 == 0, "embedding_size must be a multiple of 8"
    E2 = E // 2
    assert w_sin.shape == (order * E, E2) and w_cos.shape == (order * E, E2)
    assert bias_col.shape == (order * E, 1)
    assert abs_deltas_col.shape == (E, 1)
    assert inv_freq_col.shape == (E2, 1)
    # Note: for large E on v6e (MXU-bound regime) keep E a multiple of 256 so
    # the 256-wide MXU stays fully fed (pad upstream if necessary).

    max_tile_l, vmem_limit = _tile_defaults()
    tile_l = L if L <= max_tile_l else max_tile_l    # multiple of 128 when tiled
    grid = (order, pl.cdiv(L, tile_l))               # >= `order` parallel steps
    inv_len = 1.0 / (L - 1) if L > 1 else 0.0

    kernel = functools.partial(
        _hyena_filter_kernel,
        tile_l=tile_l, inv_len=inv_len, shift=shift,
        causal=causal, causal_limit=float(L // 2))

    return pl.pallas_call(
        kernel,
        out_shape=jax.ShapeDtypeStruct((order, E, L), out_dtype),
        grid_spec=pltpu.PrefetchScalarGridSpec(
            num_scalar_prefetch=0,
            grid=grid,
            in_specs=[
                pl.BlockSpec((E, E2), lambda o, i: (o, 0)),   # W sin cols, per order
                pl.BlockSpec((E, E2), lambda o, i: (o, 0)),   # W cos cols, per order
                pl.BlockSpec((E, 1),  lambda o, i: (o, 0)),   # bias, per order
                pl.BlockSpec((E, 1),  lambda o, i: (0, 0)),   # |deltas|, resident
                pl.BlockSpec((E2, 1), lambda o, i: (0, 0)),   # inv_freq, resident
            ],
            out_specs=pl.BlockSpec((1, E, tile_l), lambda o, i: (o, 0, i)),
        ),
        compiler_params=pltpu.CompilerParams(
            dimension_semantics=("parallel", "parallel"),
            vmem_limit_bytes=vmem_limit),
    )(w_sin, w_cos, bias_col, abs_deltas_col, inv_freq_col)


# ---------------------------------------------------------------------------
# Plain-JAX glue mirroring the PyTorch module init / forward bookkeeping.
# ---------------------------------------------------------------------------
def make_params(key, embedding_size, order):
    E, O = embedding_size, order
    kw, kb = jax.random.split(key)
    # nn.Linear(E, O*E): weight (O*E, E), bias (O*E,), U(-1/sqrt(E), 1/sqrt(E))
    bound = 1.0 / math.sqrt(E)
    weight = jax.random.uniform(kw, (O * E, E), jnp.float32, -bound, bound)
    bias = jax.random.uniform(kb, (O * E,), jnp.float32, -bound, bound)
    # ExponentialWindowModulation deltas: linspace(min_decay, max_decay, E)
    fast_decay, slow_decay, mod_bias = 0.3, 1.5, 0.01
    max_decay = math.log(mod_bias) / fast_decay
    min_decay = math.log(mod_bias) / slow_decay
    deltas = jnp.linspace(min_decay, max_decay, E).astype(jnp.float32)
    return weight, bias, deltas


def hyena_filter_forward(x, weight, bias, deltas, order, shift=0.0,
                         causal=False, out_dtype=jnp.float32):
    """Mirror of HyenaFilter.forward: x (B, L, E) [shape-only] -> h (order, E, L)."""
    _, L, E = x.shape
    # Split the weight columns to match the in-kernel [sin rows; cos rows]
    # ordering of the generated positional encoding (no interleave in-kernel).
    w_sin = weight[:, 0::2].astype(jnp.bfloat16)                  # (O*E, E//2)
    w_cos = weight[:, 1::2].astype(jnp.bfloat16)                  # (O*E, E//2)
    b_col = bias[:, None].astype(jnp.float32)                     # (O*E, 1)
    d_col = jnp.abs(deltas)[:, None].astype(jnp.float32)          # (E, 1)
    inv_freq = 1.0 / (10000.0 ** (jnp.arange(0, E, 2, dtype=jnp.float32) / E))
    invf_col = inv_freq[:, None].astype(jnp.float32)              # (E//2, 1)
    return hyena_filter_pallas(w_sin, w_cos, b_col, d_col, invf_col,
                               order=order, emb=E, seq_len=L, shift=shift,
                               causal=causal, out_dtype=out_dtype)


def positional_encoding_1d(seq_len, embedding_size):
    """f32 reference PE, PyTorch layout: (L, E), even cols sin / odd cols cos."""
    E = embedding_size
    inv_freq = 1.0 / (10000.0 ** (jnp.arange(0, E, 2, dtype=jnp.float32) / E))
    position = jnp.arange(seq_len, dtype=jnp.float32)
    ang = position[:, None] * inv_freq[None, :]                   # (L, E//2)
    pe = jnp.zeros((seq_len, E), jnp.float32)
    pe = pe.at[:, 0::2].set(jnp.sin(ang))
    pe = pe.at[:, 1::2].set(jnp.cos(ang))
    return pe


# ---------------------------------------------------------------------------
if __name__ == "__main__":
    B, L, E, ORDER = 2, 16, 32, 4     # order*E = 128 -> lane/sublane friendly

    key = jax.random.PRNGKey(0)
    kx, kp = jax.random.split(key)
    x = jax.random.normal(kx, (B, L, E), dtype=jnp.float32)
    weight, bias, deltas = make_params(kp, E, ORDER)

    h = hyena_filter_forward(x, weight, bias, deltas, ORDER)
    jax.block_until_ready(h)

    # Plain-JAX f32 reference (kernel uses bf16 MXU inputs -> loose tolerance).
    pe = positional_encoding_1d(L, E)                             # (L, E)
    h_hat = pe @ weight.T + bias[None, :]                         # (L, O*E)
    pos = jnp.linspace(0.0, 1.0, L, dtype=jnp.float32)
    mod = jnp.exp(-jnp.abs(deltas)[None, :] * pos[:, None])       # (L, E)
    h_ref = (h_hat.reshape(L, ORDER, E) * mod[:, None, :]).transpose(1, 2, 0)

    assert h.shape == (ORDER, E, L)
    assert jnp.allclose(h, h_ref, atol=3e-2, rtol=3e-2)

    print("KERNEL_OK")
</pallas_src>

<mosaic_0001>
module attributes {stable_mosaic.version = 11 : i64} {
  func.func @_hyena_filter_kernel(%arg0: i32, %arg1: i32, %arg2: memref<32x16xbf16, #tpu.memory_space<vmem>>, %arg3: memref<32x16xbf16, #tpu.memory_space<vmem>>, %arg4: memref<32x1xf32, #tpu.memory_space<vmem>>, %arg5: memref<32x1xf32, #tpu.memory_space<vmem>>, %arg6: memref<16x1xf32, #tpu.memory_space<vmem>>, %arg7: memref<1x32x16xf32, #tpu.memory_space<vmem>>) attributes {dimension_semantics = [#tpu.dimension_semantics<parallel>, #tpu.dimension_semantics<parallel>], iteration_bounds = array<i64: 4, 1>, scalar_prefetch = 0 : i64, scratch_operands = 0 : i64, tpu.core_type = #tpu.core_type<tc>, window_params = [{transform_indices = @transform_0, window_bounds = array<i64: 32, 16>}, {transform_indices = @transform_1, window_bounds = array<i64: 32, 16>}, {transform_indices = @transform_2, window_bounds = array<i64: 32, 1>}, {pipeline_mode = #tpu.pipeline_mode<synchronous>, transform_indices = @transform_3, window_bounds = array<i64: 32, 1>}, {pipeline_mode = #tpu.pipeline_mode<synchronous>, transform_indices = @transform_4, window_bounds = array<i64: 16, 1>}, {transform_indices = @transform_5, window_bounds = array<i64: 1, 32, 16>}]} {
    %0 = tpu.iota {dimensions = array<i32: 1>} : vector<1x16xi32>
    %1 = arith.sitofp %0 : vector<1x16xi32> to vector<1x16xf32>
    %c16_i32 = arith.constant 16 : i32
    %2 = arith.muli %arg1, %c16_i32 : i32
    %3 = arith.sitofp %2 : i32 to f32
    %4 = vector.broadcast %3 : f32 to vector<1x16xf32>
    %5 = arith.addf %1, %4 : vector<1x16xf32>
    %c0 = arith.constant 0 : index
    %c0_0 = arith.constant 0 : index
    %6 = vector.load %arg6[%c0, %c0_0] : memref<16x1xf32, #tpu.memory_space<vmem>>, vector<16x1xf32>
    %7 = vector.broadcast %6 : vector<16x1xf32> to vector<16x16xf32>
    %8 = vector.broadcast %5 : vector<1x16xf32> to vector<16x16xf32>
    %9 = arith.mulf %7, %8 : vector<16x16xf32>
    %10 = math.sin %9 : vector<16x16xf32>
    %11 = arith.truncf %10 : vector<16x16xf32> to vector<16x16xbf16>
    %12 = math.cos %9 : vector<16x16xf32>
    %13 = arith.truncf %12 : vector<16x16xf32> to vector<16x16xbf16>
    %c0_1 = arith.constant 0 : index
    %c0_2 = arith.constant 0 : index
    %14 = vector.load %arg2[%c0_1, %c0_2] : memref<32x16xbf16, #tpu.memory_space<vmem>>, vector<32x16xbf16>
    %cst = arith.constant dense<0.000000e+00> : vector<32x16xf32>
    %15 = tpu.matmul %14, %11, %cst {dimension_numbers = #tpu.dot_dimension_numbers<[1], [0], [0], [1], [0, 0, 1, 1], [], []>} : vector<32x16xbf16>, vector<16x16xbf16>, vector<32x16xf32> -> vector<32x16xf32>
    %c0_3 = arith.constant 0 : index
    %c0_4 = arith.constant 0 : index
    %16 = vector.load %arg3[%c0_3, %c0_4] : memref<32x16xbf16, #tpu.memory_space<vmem>>, vector<32x16xbf16>
    %cst_5 = arith.constant dense<0.000000e+00> : vector<32x16xf32>
    %17 = tpu.matmul %16, %13, %cst_5 {dimension_numbers = #tpu.dot_dimension_numbers<[1], [0], [0], [1], [0, 0, 1, 1], [], []>} : vector<32x16xbf16>, vector<16x16xbf16>, vector<32x16xf32> -> vector<32x16xf32>
    %18 = arith.addf %15, %17 : vector<32x16xf32>
    %c0_6 = arith.constant 0 : index
    %c0_7 = arith.constant 0 : index
    %19 = vector.load %arg5[%c0_6, %c0_7] : memref<32x1xf32, #tpu.memory_space<vmem>>, vector<32x1xf32>
    %cst_8 = arith.constant 0.000000e+00 : f32
    %20 = vector.broadcast %cst_8 : f32 to vector<32x1xf32>
    %21 = arith.subf %20, %19 : vector<32x1xf32>
    %cst_9 = arith.constant 0.0666666701 : f32
    %22 = vector.broadcast %cst_9 : f32 to vector<1x16xf32>
    %23 = arith.mulf %5, %22 : vector<1x16xf32>
    %24 = vector.broadcast %21 : vector<32x1xf32> to vector<32x16xf32>
    %25 = vector.broadcast %23 : vector<1x16xf32> to vector<32x16xf32>
    %26 = arith.mulf %24, %25 : vector<32x16xf32>
    %27 = math.exp %26 : vector<32x16xf32>
    %c0_10 = arith.constant 0 : index
    %c0_11 = arith.constant 0 : index
    %28 = vector.load %arg4[%c0_10, %c0_11] : memref<32x1xf32, #tpu.memory_space<vmem>>, vector<32x1xf32>
    %29 = vector.broadcast %28 : vector<32x1xf32> to vector<32x16xf32>
    %30 = arith.addf %18, %29 : vector<32x16xf32>
    %31 = arith.mulf %30, %27 : vector<32x16xf32>
    %c0_12 = arith.constant 0 : index
    %c0_13 = arith.constant 0 : index
    %c0_14 = arith.constant 0 : index
    %32 = vector.load %arg7[%c0_12, %c0_13, %c0_14] : memref<1x32x16xf32, #tpu.memory_space<vmem>>, vector<1x32x16xf32>
    %33 = vector.shape_cast %32 : vector<1x32x16xf32> to vector<32x16xf32>
    %34 = vector.shape_cast %31 : vector<32x16xf32> to vector<1x32x16xf32>
    tpu.vector_store %arg7[%c0_12, %c0_13, %c0_14], %34 {strides = array<i32>} : memref<1x32x16xf32, #tpu.memory_space<vmem>>, vector<1x32x16xf32>,
    return
  }
  func.func @transform_0(%arg0: i32, %arg1: i32) -> (i32, i32) {
    %c0_i32 = arith.constant 0 : i32
    %c0_i32_0 = arith.constant 0 : i32
    return %arg0, %c0_i32 : i32, i32
  }
  func.func @transform_1(%arg0: i32, %arg1: i32) -> (i32, i32) {
    %c0_i32 = arith.constant 0 : i32
    %c0_i32_0 = arith.constant 0 : i32
    return %arg0, %c0_i32 : i32, i32
  }
  func.func @transform_2(%arg0: i32, %arg1: i32) -> (i32, i32) {
    %c0_i32 = arith.constant 0 : i32
    %c0_i32_0 = arith.constant 0 : i32
    return %arg0, %c0_i32 : i32, i32
  }
  func.func @transform_3(%arg0: i32, %arg1: i32) -> (i32, i32) {
    %c0_i32 = arith.constant 0 : i32
    %c0_i32_0 = arith.constant 0 : i32
    %c0_i32_1 = arith.constant 0 : i32
    return %c0_i32, %c0_i32_0 : i32, i32
  }
  func.func @transform_4(%arg0: i32, %arg1: i32) -> (i32, i32) {
    %c0_i32 = arith.constant 0 : i32
    %c0_i32_0 = arith.constant 0 : i32
    %c0_i32_1 = arith.constant 0 : i32
    return %c0_i32, %c0_i32_0 : i32, i32
  }
  func.func @transform_5(%arg0: i32, %arg1: i32) -> (i32, i32, i32) {
    %c0_i32 = arith.constant 0 : i32
    %c0_i32_0 = arith.constant 0 : i32
    return %arg0, %c0_i32, %arg1 : i32, i32, i32
  }
}

</mosaic_0001>

<bundles_post_ra>
// kernel: tpu_custom_call.1
= control target key start
LH: loop header
LB: loop body
LE: loop exit
PB: predicated region body
PF: predicated region fallthrough
CT: control target
= control target key end

     0   :  { %s1230_s18 = smov 0   ;;  %s1232_s19 = smov 0   ;;  %s1382_s0 = inlined_call_operand.vmem [shape: bf16[128,16], index: 0, kind: input, shape index: {}]   ;;  %s1383_s1 = inlined_call_operand.vmem [shape: bf16[128,16], index: 1, kind: input, shape index: {}]   ;;  %s1384_s2 = inlined_call_operand.vmem [shape: f32[128,1], index: 2, kind: input, shape index: {}]   ;;  %s1385_s3 = inlined_call_operand.vmem [shape: f32[32,1], index: 3, kind: input, shape index: {}]   ;;  %s1386_s4 = inlined_call_operand.vmem [shape: f32[16,1], index: 4, kind: input, shape index: {}]   ;;  %s1387_s5 = inlined_call_operand.vmem [shape: f32[4,32,16], index: 5, kind: output, shape index: {}]  }
   0x1   :  { %s1234_s20 = smov 0  }
   0x2 LB: > { %s27_s21 = sadd.s32 1, %s1187_s19  ;;  %p1050_p0 = scmp.ge.s32.totalorder %s1191_s20, 1  ;;  %s1191_s20 = sphi %s1234_s20, %s15_s20   ;;  %s1187_s19 = sphi %s1232_s19, %s1389_s19   ;;  %s1183_s18 = sphi %s1230_s18, %s1388_s18  }
   0x3   : > { %p29_p1 = scmp.ge.s32.totalorder %s27_s21, 4  ;;  %p224_p2 = scmp.lt.s32.totalorder %s1191_s20, 5 }
   0x5   : > { %s1391_s21 = smov (%p29_p1, %s27_s21), 0  ;;  %p225_p3 = pnand %p1050_p0, %p224_p2 }
   0x6   : > { %v299_v0 = vld [vmem:[%s1386_s4] sm:$0xff] (!%p225_p3)  ;;  %s1051_s24 = sshll.u32 (!%p225_p3), %s1183_s18, 2  ;;  %v1193_v1 = vmov (!%p225_p3), 0   ;;  %v300_v2 = vld [vmem:[%s1386_s4 + $0x8] sm:$0xff] (!%p225_p3)  ;;  %v870_v3 = vld [vmem:[%s1385_s3 + $0x10] sm:$0xff] (!%p225_p3)  ;;  %vm747_vm0 = vcmask (!%p225_p3), 130048   ;;  %v292_v15 = vlaneseq (!%p225_p3) }
   0x7   : > { %228 = sbr.rel (%p225_p3) target bundleno = 456 (0x1c8), region = 40  ;;  %1147 = vset.pattern.permute.xlu0 (!%p225_p3), %v1193_v1  ;;  %p266_p4 = scmp.lt.s32.totalorder (!%p225_p3), %s1051_s24, 15  ;;  %1148 = vset.pattern.permute.xlu1 (!%p225_p3), %v1193_v1  ;;  %v874_v4 = vsub.f32 (!%p225_p3), 0.0, %v870_v3  ;;  %v868_v9 = vld [vmem:[%s1385_s3] sm:$0xff] (!%p225_p3)  ;;  %v869_v10 = vld [vmem:[%s1385_s3 + $0x8] sm:$0xff] (!%p225_p3)  ;;  %v871_v13 = vld [vmem:[%s1385_s3 + $0x18] sm:$0xff] (!%p225_p3) }
   0x8   : > { %303 = vperm.xlu0 (!%p225_p3), %1147, %v299_v0   ;;  %v872_v11 = vsub.f32 (!%p225_p3), 0.0, %v868_v9  ;;  %v873_v12 = vsub.f32 (!%p225_p3), 0.0, %v869_v10  ;;  %v875_v14 = vsub.f32 (!%p225_p3), 0.0, %v871_v13  ;;  %v293_v17 = vand.u32 (!%p225_p3), 127, %v292_v15  ;;  %p283_p5 = scmp.lt.s32.totalorder (!%p225_p3), %s1183_s18, 3 }
   0x9   : > { %v1194_v40 = vmov (!%p225_p3), 683565275   ;;  %v1195_v44 = vmov (!%p225_p3), 2475754826   ;;  %v1196_v46 = vmov (!%p225_p3), 2131351028  }
   0xa   : > { %879 = vperm.xlu1 (!%p225_p3), %1148, %v872_v11   ;;  %v1286_v19 = vcvt.s32.f32 (!%p225_p3), %v293_v17  ;;  %v1197_v48 = vmov (!%p225_p3), 2102212464   ;;  %v1198_v50 = vmov (!%p225_p3), 920167782   ;;  %v1199_v57 = vmov (!%p225_p3), 1326507024  }
   0xc   : > { %308 = vperm.xlu0 (!%p225_p3), %1147, %v300_v2  }
   0xe   : > { %s1393_s24 = smov (!%p266_p4, %s1051_s24), 15  ;;  %884 = vperm.xlu1 %1148, %v873_v12   ;;  %s1395_s18 = smov (!%p283_p5, %s1183_s18), 3 }
   0xf   : > { %s1056_s29 = sshll.u32 %s1393_s24, 3  ;;  %s1052_s8 = sshll.u32 %s1393_s24, 2 }
  0x10   : > { %s281_s7 = scalar_lea.vmem %s1384_s2, %s1056_s29  ;;  %889 = vperm.xlu0 %1147, %v874_v4   ;;  %s1266_s11 = scalar_lea.vmem %s1383_s1, %s1052_s8 }
  0x11   : > { %v909_v5 = vld [vmem:[%s281_s7] sm:$0xff]  ;;  %v911_v6 = vld [vmem:[%s281_s7 + $0x10] sm:$0xff]  ;;  %s1271_s14 = scalar_lea.vmem %s1382_s0, %s1052_s8  ;;  %v910_v16 = vld [vmem:[%s281_s7 + $0x8] sm:$0xff]  ;;  %s1085_s25 = sshll.u32 %s1395_s18, 5 }
  0x12   : > { %v1149_v7 = vld [vmem:[%s1266_s11] sm:$0xff]   ;;  %894 = vperm.xlu1 %1148, %v875_v14   ;;  %v912_v18 = vld [vmem:[%s281_s7 + $0x18] sm:$0xff]  ;;  %s290_s28 = scalar_lea.vmem %s1387_s5, %s1085_s25 }
  0x13   : > { %v1150_v8 = vld [vmem:[%s1271_s14] sm:$0xff]   ;;  %1094 = vmatprep.mubr.msk.bf16.mxu1 %vm747_vm0, %v1149_v7 }
  0x14   : > { %915 = vperm.xlu0 %1147, %v909_v5   ;;  %1100 = vmatprep.mubr.msk.bf16.mxu0 %vm747_vm0, %v1150_v8 }
  0x16   : > { %920 = vperm.xlu1 %1148, %v910_v16  }
  0x18   : > { %925 = vperm.xlu0 %1147, %v911_v6  }
  0x1a   : > { %930 = vperm.xlu1 %1148, %v912_v18  }
  0x87   : > { %v304_v20 = vpop.permute.xlu0 %303 }
  0x88   : > { %v1289_v21 = vmul.f32 %v304_v20, %v1286_v19 }
  0x8a   : > { %v313_v22 = vand.u32 2147483647, %v1289_v21  ;;  %v316_v23 = vand.u32 2139095040, %v1289_v21  ;;  %vm315_vm15 = vcmp.lt.s32.totalorder %v1289_v21, 0 }
  0x8b   : > { %v309_v24 = vpop.permute.xlu0 %308 }
  0x8c   : > { %v317_v25 = vshrl.u32 %v316_v23, 23  ;;  %v1294_v26 = vmul.f32 %v309_v24, %v1286_v19  ;;  %v320_v27 = vand.u32 8388607, %v313_v22 }
  0x8e   : > { %v1059_v28 = vadd.s32 4294967169, %v317_v25  ;;  %v420_v29 = vand.u32 2139095040, %v1294_v26  ;;  %v321_v31 = vor.u32 8388608, %v320_v27  ;;  %v417_v33 = vand.u32 2147483647, %v1294_v26 }
  0x90   : > { %v323_v30 = vadd.s32 1, %v1059_v28  ;;  %v421_v32 = vshrl.u32 %v420_v29, 23  ;;  %v1300_v38 = vshll.u32 %v321_v31, 8  ;;  %v424_v42 = vand.u32 8388607, %v417_v33 }
  0x92   : > { %vm324_vm1 = vcmp.gt.s32.totalorder %v323_v30, 0  ;;  %v1063_v35 = vadd.s32 4294967169, %v421_v32  ;;  %v425_v8 = vor.u32 8388608, %v424_v42 }
  0x93   : > { %v325_v34 = vsel %vm324_vm1, %v323_v30, 0  ;;  %vm314_vm1 = vcmp.le.f32.partialorder %v313_v22, 0.7853982 }
  0x94   : > { %v326_v36 = vshrl.u32 %v325_v34, 5  ;;  %v327_v37 = vand.u32 31, %v325_v34  ;;  %v427_v43 = vadd.s32 1, %v1063_v35  ;;  %v465_v24 = vshll.u32 %v425_v8, 8 }
  0x96   : > { %v328_v39 = vsub.s32 32, %v327_v37  ;;  %v330_v41 = vshll.u32 %v1194_v40, %v327_v37  ;;  %v333_v45 = vshll.u32 %v1195_v44, %v327_v37  ;;  %v336_v47 = vshll.u32 %v1196_v46, %v327_v37 }
  0x97   : > { %v339_v49 = vshll.u32 %v1197_v48, %v327_v37  ;;  %v342_v51 = vshll.u32 %v1198_v50, %v327_v37  ;;  %vm345_vm2 = vcmp.lt.s32.totalorder %v326_v36, 1  ;;  %vm347_vm3 = vcmp.lt.s32.totalorder %v326_v36, 3 }
  0x98   : > { %v331_v52 = vshrl.u32 %v1195_v44, %v328_v39  ;;  %v334_v53 = vshrl.u32 %v1196_v46, %v328_v39  ;;  %v337_v54 = vshrl.u32 %v1197_v48, %v328_v39  ;;  %v329_v55 = vshrl.u32 %v1194_v40, %v328_v39 }
  0x99   : > { %v340_v56 = vshrl.u32 %v1198_v50, %v328_v39  ;;  %v343_v58 = vshrl.u32 %v1199_v57, %v328_v39  ;;  %vm428_vm4 = vcmp.gt.s32.totalorder %v427_v43, 0  ;;  %vm348_vm5 = vcmp.lt.s32.totalorder %v326_v36, 4 }
  0x9a   : > { %v332_v59 = vor.u32 %v331_v52, %v330_v41  ;;  %v335_v60 = vor.u32 %v334_v53, %v333_v45  ;;  %v338_v61 = vor.u32 %v337_v54, %v336_v47  ;;  %v429_v0 = vsel %vm428_vm4, %v427_v43, 0 }
  0x9b   : > { %v341_v62 = vor.u32 %v340_v56, %v339_v49  ;;  %v344_v63 = vor.u32 %v343_v58, %v342_v51  ;;  %vm346_vm6 = vcmp.lt.s32.totalorder %v326_v36, 2  ;;  %v431_v11 = vand.u32 31, %v429_v0 }
  0x9c   : > { %v349_v1 = vsel %vm345_vm2, %v329_v55, %v332_v59  ;;  %v350_v2 = vsel %vm348_vm5, %v338_v61, 2102212464  ;;  %v353_v3 = vsel %vm345_vm2, %v332_v59, %v335_v60  ;;  %v357_v4 = vsel %vm345_vm2, %v335_v60, %v338_v61 }
  0x9d   : > { %v351_v5 = vsel %vm347_vm3, %v335_v60, %v350_v2  ;;  %v354_v6 = vsel %vm348_vm5, %v341_v62, 920167782  ;;  %v358_v7 = vsel %vm348_vm5, %v344_v63, 1326507024  ;;  %v430_v20 = vshrl.u32 %v429_v0, 5 }
  0x9e   : > { %v355_v9 = vsel %vm347_vm3, %v338_v61, %v354_v6  ;;  %v359_v10 = vsel %vm347_vm3, %v341_v62, %v358_v7  ;;  %v352_v12 = vsel %vm346_vm6, %v349_v1, %v351_v5  ;;  %v432_v23 = vsub.s32 32, %v431_v11 }
  0x9f   : > { %v356_v13 = vsel %vm346_vm6, %v353_v3, %v355_v9  ;;  %v360_v14 = vsel %vm346_vm6, %v357_v4, %v359_v10  ;;  %v368_v25 = vmul.u32 %v1300_v38, %v352_v12  ;;  %v434_v27 = vshll.u32 %v1194_v40, %v431_v11 }
  0xa0   : > { %v1313_v15 = vmul.u32.u64.low %v1300_v38, %v360_v14  ;;  %v1314_v16 = vmul.u32.u64.high %v1300_v38, %v360_v14, %v1313_v15  ;;  %v1317_v17 = vmul.u32.u64.low %v1300_v38, %v356_v13  ;;  %v1318_v18 = vmul.u32.u64.high %v1300_v38, %v356_v13, %v1317_v17 }
  0xa1   : > { %v437_v28 = vshll.u32 %v1195_v44, %v431_v11  ;;  %v440_v29 = vshll.u32 %v1196_v46, %v431_v11  ;;  %v435_v30 = vshrl.u32 %v1195_v44, %v432_v23  ;;  %v438_v31 = vshrl.u32 %v1196_v46, %v432_v23 }
  0xa2   : > { %v441_v32 = vshrl.u32 %v1197_v48, %v432_v23  ;;  %v443_v34 = vshll.u32 %v1197_v48, %v431_v11  ;;  %vm370_vm7 = vc.u32 %v1314_v16, %v1317_v17  ;;  %v371_v35 = vadd.s32 1, %v1318_v18 }
  0xa3   : > { %v444_v36 = vshrl.u32 %v1198_v50, %v432_v23  ;;  %v446_v37 = vshll.u32 %v1198_v50, %v431_v11  ;;  %v436_v39 = vor.u32 %v435_v30, %v434_v27  ;;  %v439_v41 = vor.u32 %v438_v31, %v437_v28 }
  0xa4   : > { %v442_v42 = vor.u32 %v441_v32, %v440_v29  ;;  %v447_v43 = vshrl.u32 %v1199_v57, %v432_v23  ;;  %v372_v38 = vsel %vm370_vm7, %v371_v35, %v1318_v18  ;;  %vm449_vm8 = vcmp.lt.s32.totalorder %v430_v20, 1 }
  0xa5   : > { %v445_v45 = vor.u32 %v444_v36, %v443_v34  ;;  %vm452_vm9 = vcmp.lt.s32.totalorder %v430_v20, 4  ;;  %v373_v44 = vadd.s32 %v372_v38, %v368_v25  ;;  %vm451_vm10 = vcmp.lt.s32.totalorder %v430_v20, 3 }
  0xa6   : > { %v448_v46 = vor.u32 %v447_v43, %v446_v37  ;;  %v454_v47 = vsel %vm452_vm9, %v442_v42, 2102212464  ;;  %v433_v48 = vshrl.u32 %v1194_v40, %v432_v23  ;;  %v457_v49 = vsel %vm449_vm8, %v436_v39, %v439_v41 }
  0xa7   : > { %v458_v51 = vsel %vm452_vm9, %v445_v45, 920167782  ;;  %v461_v52 = vsel %vm449_vm8, %v439_v41, %v442_v42  ;;  %v374_v53 = vadd.s32 536870912, %v373_v44  ;;  %vm450_vm11 = vcmp.lt.s32.totalorder %v430_v20, 2 }
  0xa8   : > { %v459_v50 = vsel %vm451_vm10, %v442_v42, %v458_v51  ;;  %v462_v54 = vsel %vm452_vm9, %v448_v46, 1326507024  ;;  %v453_v55 = vsel %vm449_vm8, %v433_v48, %v436_v39  ;;  %v455_v56 = vsel %vm451_vm10, %v439_v41, %v454_v47 }
  0xa9   : > { %v460_v57 = vsel %vm450_vm11, %v457_v49, %v459_v50  ;;  %v463_v58 = vsel %vm451_vm10, %v445_v45, %v462_v54  ;;  %v1328_v59 = vshrl.u32 %v374_v53, 30  ;;  %v456_v1 = vsel %vm450_vm11, %v453_v55, %v455_v56 }
  0xaa   : > { %v464_v60 = vsel %vm450_vm11, %v461_v52, %v463_v58  ;;  %v1330_v61 = vmul.u32.u64.low %v465_v24, %v460_v57  ;;  %v1331_v62 = vmul.u32.u64.high %v465_v24, %v460_v57, %v1330_v61  ;;  %v472_v4 = vmul.u32 %v465_v24, %v456_v1 }
  0xab   : > { %v1333_v63 = vmul.u32.u64.low %v465_v24, %v464_v60  ;;  %v1334_v0 = vmul.u32.u64.high %v465_v24, %v464_v60, %v1333_v63  ;;  %v376_v40 = vshll.u32 %v1328_v59, 30  ;;  %v369_v18 = vadd.s32 %v1317_v17, %v1314_v16 }
  0xac   : > { %v475_v3 = vadd.s32 1, %v1331_v62  ;;  %v399_v52 = vsub.s32 4, %v1328_v59  ;;  %vm419_vm2 = vcmp.lt.s32.totalorder %v1294_v26, 0  ;;  %vm418_vm3 = vcmp.le.f32.partialorder %v417_v33, 0.7853982 }
  0xad   : > { %v377_v2 = vsub.s32 %v373_v44, %v376_v40  ;;  %vm474_vm12 = vc.u32 %v1334_v0, %v1330_v61  ;;  %v473_v42 = vadd.s32 %v1330_v61, %v1334_v0 }
  0xae   : > { %v476_v6 = vsel %vm474_vm12, %v475_v3, %v1331_v62  ;;  %v400_v56 = vsel %vm315_vm15, %v399_v52, %v1328_v59 }
  0xaf   : > { %v379_v5 = vsub.s32 0, %v377_v2  ;;  %v477_v7 = vadd.s32 %v476_v6, %v472_v4  ;;  %v402_v22 = vsel %vm314_vm1, 0, %v400_v56 }
  0xb0   : > { %v406_v63 = vadd.s32 3, %v402_v22 }
  0xb1   : > { %v1060_v8 = vmin.u32 %v379_v5, %v377_v2  ;;  %v478_v9 = vadd.s32 536870912, %v477_v7 }
  0xb2   : > { %v407_v59 = vand.u32 3, %v406_v63 }
  0xb3   : > { %v381_v10 = vclz %v1060_v8  ;;  %v479_v11 = vshrl.u32 %v478_v9, 30 }
  0xb4   : > { %vm409_vm6 = vcmp.eq.s32.totalorder %v407_v59, 0  ;;  %vm412_vm7 = vcmp.eq.s32.totalorder %v407_v59, 2  ;;  %vm408_vm10 = vcmp.lt.s32.totalorder %v407_v59, 2 }
  0xb5   : > { %v1061_v12 = vadd.s32 4294967294, %v381_v10  ;;  %v480_v13 = vshll.u32 %v479_v11, 30  ;;  %v503_v55 = vsub.s32 4, %v479_v11 }
  0xb7   : > { %vm1062_vm13 = vcmp.lt.s32.totalorder %v1061_v12, 0  ;;  %v481_v15 = vsub.s32 %v477_v7, %v480_v13  ;;  %v504_v60 = vsel %vm419_vm2, %v503_v55, %v479_v11 }
  0xb8   : > { %v384_v14 = vsel %vm1062_vm13, 0, %v1061_v12  ;;  %v506_v62 = vsel %vm418_vm3, 0, %v504_v60 }
  0xb9   : > { %v385_v20 = vsub.s32 32, %v384_v14  ;;  %v389_v23 = vsub.s32 4294967266, %v384_v14  ;;  %v483_v24 = vsub.s32 0, %v481_v15  ;;  %v386_v25 = vshll.u32 %v377_v2, %v384_v14 }
  0xba   : > { %v510_v1 = vadd.s32 3, %v506_v62  ;;  %v615_v2 = vand.u32 3, %v402_v22  ;;  %v718_v5 = vand.u32 3, %v506_v62 }
  0xbb   : > { %v387_v27 = vshrl.u32 %v369_v18, %v385_v20  ;;  %v390_v28 = vadd.s32 127, %v389_v23  ;;  %v1064_v29 = vmin.u32 %v483_v24, %v481_v15 }
  0xbc   : > { %v511_v6 = vand.u32 3, %v510_v1  ;;  %vm617_vm4 = vcmp.eq.s32.totalorder %v615_v2, 0  ;;  %vm620_vm5 = vcmp.eq.s32.totalorder %v615_v2, 2  ;;  %vm616_vm8 = vcmp.lt.s32.totalorder %v615_v2, 2 }
  0xbd   : > { %v388_v30 = vor.u32 %v387_v27, %v386_v25  ;;  %v391_v31 = vshll.u32 %v390_v28, 23  ;;  %v485_v32 = vclz %v1064_v29  ;;  %vm720_vm9 = vcmp.eq.s32.totalorder %v718_v5, 0 }
  0xbe   : > { %vm723_vm11 = vcmp.eq.s32.totalorder %v718_v5, 2  ;;  %vm513_vm12 = vcmp.eq.s32.totalorder %v511_v6, 0  ;;  %vm516_vm13 = vcmp.eq.s32.totalorder %v511_v6, 2 }
  0xbf   : > { %v392_v34 = vor.u32 4788187, %v391_v31  ;;  %v1065_v35 = vadd.s32 4294967294, %v485_v32  ;;  %v395_v37 = vcvt.s32.f32 %v388_v30 }
  0xc1   : > { %v393_v36 = vand.u32 2147483647, %v392_v34  ;;  %vm1066_vm14 = vcmp.lt.s32.totalorder %v1065_v35, 0 }
  0xc2   : > { %v488_v41 = vsel %vm1066_vm14, 0, %v1065_v35  ;;  %vm719_vm14 = vcmp.lt.s32.totalorder %v718_v5, 2  ;;  %v1151_v35 = vld [vmem:[%s1266_s11 + $0x8] sm:$0xff]  }
  0xc3   : > { %v396_v39 = vmul.f32 %v395_v37, %v393_v36  ;;  %v489_v16 = vsub.s32 32, %v488_v41  ;;  %v493_v17 = vsub.s32 4294967266, %v488_v41  ;;  %v490_v38 = vshll.u32 %v481_v15, %v488_v41  ;;  %v1152_v36 = vld [vmem:[%s1271_s14 + $0x8] sm:$0xff]  }
  0xc4   : > { %v876_v37 = vmul.f32 0.06666667, %v1286_v19 }
  0xc5   : > { %v397_v43 = vxor.u32 2147483648, %v396_v39  ;;  %v491_v45 = vshrl.u32 %v473_v42, %v489_v16  ;;  %v494_v44 = vadd.s32 127, %v493_v17 }
  0xc7   : > { %v398_v46 = vsel %vm315_vm15, %v397_v43, %v396_v39  ;;  %v492_v47 = vor.u32 %v491_v45, %v490_v38  ;;  %v495_v48 = vshll.u32 %v494_v44, 23  ;;  %vm512_vm15 = vcmp.lt.s32.totalorder %v511_v6, 2  ;;  %v890_v39 = vpop.permute.xlu0 %889 }
  0xc8   : > { %v401_v49 = vsel %vm314_vm1, %v1289_v21, %v398_v46  ;;  %vm405_vm1 = vweird.f32 %v1289_v21  ;;  %v880_v21 = vpop.permute.xlu1 %879  ;;  %v899_v41 = vmul.f32 %v890_v39, %v876_v37 }
  0xc9   : > { %v496_v51 = vor.u32 4788187, %v495_v48  ;;  %v499_v50 = vcvt.s32.f32 %v492_v47  ;;  %1153 = vcosq.f32 %v401_v49  ;;  %v897_v42 = vmul.f32 %v880_v21, %v876_v37 }
  0xca   : > { %1155 = vsinq.f32 %v401_v49  ;;  %v905_v38 = vmul.f32 1.442695, %v899_v41 }
  0xcb   : > { %v497_v53 = vand.u32 2147483647, %v496_v51  ;;  %v901_v45 = vmul.f32 1.442695, %v897_v42  ;;  %v916_v46 = vpop.permute.xlu0 %915 }
  0xcd   : > { %v500_v54 = vmul.f32 %v499_v50, %v497_v53 }
  0xcf   : > { %v501_v57 = vxor.u32 2147483648, %v500_v54  ;;  %v926_v19 = vpop.permute.xlu0 %925 }
  0xd1   : > { %v502_v58 = vsel %vm419_vm2, %v501_v57, %v500_v54  ;;  %vm509_vm2 = vweird.f32 %v1294_v26 }
  0xd2   : > { %v505_v61 = vsel %vm418_vm3, %v1294_v26, %v502_v58  ;;  %v885_v26 = vpop.permute.xlu1 %884 }
  0xd3   : > { %1157 = vcosq.f32 %v505_v61  ;;  %v1154_v0 = vpop.eup %1153  ;;  %v898_v43 = vmul.f32 %v885_v26, %v876_v37 }
  0xd4   : > { %1159 = vsinq.f32 %v505_v61  ;;  %v1156_v40 = vpop.eup %1155  ;;  %v413_v4 = vxor.u32 2147483648, %v1154_v0 }
  0xd5   : > { %v410_v3 = vxor.u32 2147483648, %v1156_v40  ;;  %v903_v47 = vmul.f32 1.442695, %v898_v43  ;;  %1161 = vpow2.f32 %v905_v38 }
  0xd6   : > { %v622_v8 = vsel %vm620_vm5, %v413_v4, %v1156_v40  ;;  %v414_v10 = vsel %vm412_vm7, %v413_v4, %v1156_v40  ;;  %v895_v16 = vpop.permute.xlu1 %894  ;;  %1163 = vpow2.f32 %v901_v45 }
  0xd7   : > { %v619_v7 = vsel %vm617_vm4, %v1154_v0, %v410_v3  ;;  %v411_v9 = vsel %vm409_vm6, %v1154_v0, %v410_v3  ;;  %v900_v17 = vmul.f32 %v895_v16, %v876_v37 }
  0xd8   : > { %v623_v14 = vsel %vm616_vm8, %v619_v7, %v622_v8  ;;  %v415_v18 = vsel %vm408_vm10, %v411_v9, %v414_v10 }
  0xd9   : > { %v624_v28 = vsel %vm405_vm1, nan, %v623_v14  ;;  %v416_v30 = vsel %vm405_vm1, nan, %v415_v18  ;;  %v907_v44 = vmul.f32 1.442695, %v900_v17 }
  0xda   : > { %v921_v48 = vpop.permute.xlu1 %920 }
  0xdb   : > { %1165 = vpow2.f32 %v907_v44 }
  0xdc   : > { %1167 = vpow2.f32 %v903_v47 }
  0xdd   : > { %v1158_v33 = vpop.eup %1157 }
  0xde   : > { %v1160_v11 = vpop.eup %1159  ;;  %v517_v12 = vxor.u32 2147483648, %v1158_v33  ;;  %v931_v62 = vpop.permute.xlu1 %930 }
  0xdf   : > { %v514_v13 = vxor.u32 2147483648, %v1160_v11  ;;  %v1162_v61 = vpop.eup %1161 }
  0xe0   : > { %v725_v15 = vsel %vm723_vm11, %v517_v12, %v1160_v11  ;;  %v518_v20 = vsel %vm516_vm13, %v517_v12, %v1160_v11  ;;  %v1164_v40 = vpop.eup %1163 }
  0xe1   : > { %v722_v23 = vsel %vm720_vm9, %v1158_v33, %v514_v13  ;;  %v515_v24 = vsel %vm513_vm12, %v1158_v33, %v514_v13 }
  0xe2   : > { %v726_v25 = vsel %vm719_vm14, %v722_v23, %v725_v15  ;;  %v519_v27 = vsel %vm512_vm15, %v515_v24, %v518_v20 }
  0xe3   : > { %v727_v29 = vsel %vm509_vm2, nan, %v726_v25  ;;  %v520_v31 = vsel %vm509_vm2, nan, %v519_v27 }
  0xe4   : > { %v728_v32 = vpack.c.bf16 %v727_v29, %v624_v28  ;;  %v521_v34 = vpack.c.bf16 %v520_v31, %v416_v30 }
  0xe5   : > { %v1166_v59 = vpop.eup %1165 }
  0xe6   : > { %1092 = vmatprep.subr.bf16.mxu1 %v728_v32  ;;  %1098 = vmatprep.subr.bf16.mxu0 %v521_v34  ;;  %v1168_v5 = vpop.eup %1167 }
  0xe7   : > { %1093 = vmatpush3.bf16.msra.mxu1 %v728_v32  ;;  %1099 = vmatpush3.bf16.msra.mxu0 %v521_v34 }
  0xea   : > { %1095 = vmatmul.mubr.msk.bf16.vlgmr.msra.gmra.mrb[0].mxu1 %vm747_vm0, %v1151_v35  ;;  %1101 = vmatmul.mubr.msk.bf16.vlgmr.msra.gmra.mrb[0].mxu0 %vm747_vm0, %v1152_v36 }
 0x1bd   : > { %v1096_v49 = vpop.f32.mrb[0].mxu1  ;;  %v1102_v51 = vpop.f32.mrb[0].mxu0 }
 0x1be   : > { %v862_v52 = vadd.f32 %v1102_v51, %v1096_v49  ;;  %v788_v53 = vpop.f32.mrb[1].mxu1  ;;  %v853_v50 = vpop.f32.mrb[1].mxu0 }
 0x1bf   : > { %v854_v54 = vadd.f32 %v853_v50, %v788_v53  ;;  %v1097_v55 = vpop.f32.mrb[2].mxu1  ;;  %v1103_v56 = vpop.f32.mrb[2].mxu0 }
 0x1c0   : > { %v935_v57 = vadd.f32 %v926_v19, %v862_v52  ;;  %v865_v58 = vadd.f32 %v1103_v56, %v1097_v55  ;;  %v791_v22 = vpop.f32.mrb[3].mxu1  ;;  %v856_v60 = vpop.f32.mrb[3].mxu0 }
 0x1c1   : > { %v933_v63 = vadd.f32 %v916_v46, %v854_v54  ;;  %v857_v0 = vadd.f32 %v856_v60, %v791_v22 }
 0x1c2   : > { %v939_v1 = vmul.f32 %v1162_v61, %v935_v57  ;;  %v936_v2 = vadd.f32 %v931_v62, %v865_v58 }
 0x1c3   : > { %v937_v3 = vmul.f32 %v1164_v40, %v933_v63  ;;  %v934_v4 = vadd.f32 %v921_v48, %v857_v0 }
 0x1c4   : > { %943 = vst.msk [vmem:[%s290_s28 + $0x10] sm:$0xff] %vm747_vm0, %v939_v1  ;;  %v940_v6 = vmul.f32 %v1166_v59, %v936_v2 }
 0x1c5   : > { %941 = vst.msk [vmem:[%s290_s28] sm:$0xff] %vm747_vm0, %v937_v3  ;;  %v938_v33 = vmul.f32 %v1168_v5, %v934_v4 }
 0x1c6   : > { %944 = vst.msk [vmem:[%s290_s28 + $0x18] sm:$0xff] %vm747_vm0, %v940_v6 }
 0x1c7   : > { %942 = vst.msk [vmem:[%s290_s28 + $0x8] sm:$0xff] %vm747_vm0, %v938_v33 }
 0x1c8 PF: > { %s15_s20 = sadd.s32 1, %s1191_s20   ;;  %s1388_s18 = smov %s1187_s19 }
 0x1c9   : > { %p12_p6 = scmp.ge.s32.totalorder %s15_s20, 6   ;;  %s1389_s19 = smov %s1391_s21 }
 0x1cb   :  { %14 = sbr.rel (!%p12_p6) target bundleno = 2 (0x2), region = 76 }

</bundles_post_ra>
